<compile_context>
chip_gen: v5e
topology: v5e:2x2
jax: 0.10.0
libtpu: 0.0.40
codegen_flags: <defaults>
</compile_context>

<pallas_src>
import functools

import jax
import jax.numpy as jnp
from jax import lax
from jax.experimental import pallas as pl
from jax.experimental.pallas import tpu as pltpu

BI_MARGIN = 24.0
TRADEOFF = 0.01


def _dsh_tiled_kernel(
    blk_i_ref, blk_j_ref,                 # scalar-prefetch block coords (SMEM)
    xr_ref, xc_ref, tcol_ref, trow_ref,   # inputs: row slab, col slab, label col/row
    out_ref,                              # output: (1,1) f32 scalar loss (SMEM)
    acc_ref, d1_ref,                      # scratch: VMEM (1,tile) f32, SMEM (1,) f32
    *, n_actual, n_padded, tile):
    g = pl.program_id(0)
    bi = blk_i_ref[g]
    bj = blk_j_ref[g]

    @pl.when(g == 0)
    def _init():
        acc_ref[...] = jnp.zeros_like(acc_ref)
        d1_ref[0] = 0.0

    xr = xr_ref[...]                       # (tile, C) f32
    xc = xc_ref[...]                       # (tile, C) f32
    c = xr.shape[1]
    ones_row = jnp.ones((1, c), jnp.float32)

    # -2 * x_r . x_c^T on the MXU; -2 folded into the small row-slab operand so no
    # O(tile^2) scale is needed. Contracting the last dims of both operands avoids a
    # materialized transposed copy of the column slab (same form flash-attn's q.k^T uses).
    gram_m2 = lax.dot_general(xr * (-2.0), xc, (((1,), (1,)), ((), ())),
                              preferred_element_type=jnp.float32)        # (tile, tile)
    # Row-slab squared norms as a column (sublane-wise; no relayout).
    nr = jnp.sum(xr * xr, axis=1, keepdims=True)                         # (tile, 1)
    # Column-slab squared norms directly as a lane vector via the MXU -> no transpose.
    nc = lax.dot_general(ones_row, xc * xc, (((1,), (1,)), ((), ())),
                         preferred_element_type=jnp.float32)             # (1, tile)

    d = jnp.maximum(nr + (gram_m2 + nc), 0.0)                            # pairwise sq dist
    same = tcol_ref[...] == trow_ref[...]                                # (tile, tile)
    # 0.5*D*S + 0.5*relu(m-D)*(1-S) == 0.5*where(S, D, relu(m-D)); 0.5 folded into scale.
    pair = jnp.where(same, d, jnp.maximum(BI_MARGIN - d, 0.0))

    if n_actual != n_padded:  # static Python check: only traced when padding exists
        row_ids = bi * tile + lax.broadcasted_iota(jnp.int32, (tile, 1), 0)
        col_ids = bj * tile + lax.broadcasted_iota(jnp.int32, (1, tile), 1)
        pair = jnp.where((row_ids < n_actual) & (col_ids < n_actual), pair, 0.0)

    # Accumulate weighted per-block sublane reductions into the lane-vector accumulator.
    weight = jnp.where(bi == bj, 1.0, 2.0).astype(jnp.float32)
    acc_ref[...] += weight * jnp.sum(pair, axis=0, keepdims=True)        # (1, tile)

    @pl.when(bj == 0)  # one pass per row block, not per (i, j) block
    def _d1():
        d1_ref[0] += jnp.sum(jnp.abs(jnp.abs(xr) - 1.0))

    @pl.when(g == pl.num_programs(0) - 1)
    def _finalize():
        # Masked mean over the strict lower triangle (mask.sum() = N(N-1)/2):
        #   pair term: sum_{i>j} = full_sum / 2   -> 0.5 * full_sum / (N(N-1)) with the
        #              module's extra 0.5 folded in => 0.5/(N(N-1)) applied to full_sum.
        #   d1 term  : sum_{i>j}(d1_i + d1_j) = (N-1) * sum(d1) -> 2*tradeoff*sum(d1)/N.
        pair_scale = 0.5 / float(n_actual * (n_actual - 1))
        iod_scale = 2.0 * TRADEOFF / float(n_actual)
        out_ref[0, 0] = pair_scale * jnp.sum(acc_ref[...]) + iod_scale * d1_ref[0]


def _round_up(x, m):
    return ((x + m - 1) // m) * m


def dsh_loss(inputs, target, *, block=512, use_pallas=None):
    """inputs: (N, C) float hash codes; target: (N,) integer or float class labels."""
    n, c = inputs.shape
    assert n >= 2, "DSH loss needs at least 2 samples (no off-diagonal pairs otherwise)"

    if use_pallas is None:
        # Below ~512 rows the (N,N) pass is a few microseconds of VPU work and the fixed
        # pallas_call / DMA overhead dominates; let XLA fuse the plain formulation.
        use_pallas = n >= 512
    if not use_pallas:
        return _dsh_loss_ref(inputs, target)

    x = inputs.astype(jnp.float32)
    if jnp.issubdtype(target.dtype, jnp.floating):
        t = target.astype(jnp.float32)
    else:
        t = target.astype(jnp.int32)

    block = _round_up(int(block), 128)
    tile = min(block, _round_up(n, 128))       # lane-aligned square pair-block tile
    n_pad = _round_up(n, tile)
    if n_pad != n:
        # Pad codes with 1.0 (|abs(1)-1| == 0 -> pad rows add nothing to the d1 term);
        # padded pair contributions are masked inside the kernel.
        x = jnp.pad(x, ((0, n_pad - n), (0, 0)), constant_values=1.0)
        t = jnp.pad(t, (0, n_pad - n))
    t_col = t.reshape(n_pad, 1)
    t_row = t.reshape(1, n_pad)

    # Lower-triangle (incl. diagonal) block coordinates, scalar-prefetched into SMEM.
    nb = n_pad // tile
    blk_i, blk_j = [], []
    for i in range(nb):
        for j in range(i + 1):
            blk_i.append(i)
            blk_j.append(j)
    nblk = len(blk_i)
    blk_i = jnp.asarray(blk_i, jnp.int32)
    blk_j = jnp.asarray(blk_j, jnp.int32)

    kernel = functools.partial(_dsh_tiled_kernel,
                               n_actual=n, n_padded=n_pad, tile=tile)

    # TODO(synk): on v7x (2 TensorCores) emit per-row-block partial sums on a "parallel"
    # row axis instead of a single cross-grid accumulator, and feed bf16 slab copies to
    # the MXU for large code lengths (keep D / pair math in f32).
    out = pl.pallas_call(
        kernel,
        out_shape=jax.ShapeDtypeStruct((1, 1), jnp.float32),
        grid_spec=pltpu.PrefetchScalarGridSpec(
            num_scalar_prefetch=2,
            grid=(nblk,),
            in_specs=[
                pl.BlockSpec((tile, c), lambda g, bi, bj: (bi[g], 0)),   # x row slab
                pl.BlockSpec((tile, c), lambda g, bi, bj: (bj[g], 0)),   # x col slab
                pl.BlockSpec((tile, 1), lambda g, bi, bj: (bi[g], 0)),   # labels (col)
                pl.BlockSpec((1, tile), lambda g, bi, bj: (0, bj[g])),   # labels (row)
            ],
            out_specs=pl.BlockSpec(memory_space=pltpu.MemorySpace.SMEM),
            scratch_shapes=[
                pltpu.VMEM((1, tile), jnp.float32),   # lane-vector pair accumulator
                pltpu.SMEM((1,), jnp.float32),        # d1 scalar accumulator
            ],
        ),
        compiler_params=pltpu.CompilerParams(
            dimension_semantics=("arbitrary",),        # sequential accumulator grid
        ),
    )(blk_i, blk_j, x, x, t_col, t_row)
    return out[0, 0]


def _dsh_loss_ref(x, t):
    # Pure-JAX mirror of the PyTorch forward (explicit mask + runtime denominator).
    x = x.astype(jnp.float32)
    n = x.shape[0]
    x_norm = jnp.sum(x * x, axis=1, keepdims=True)
    D = jnp.maximum(x_norm + x_norm.T - 2.0 * (x @ x.T), 0.0)
    S = (t[:, None] == t[None, :]).astype(jnp.float32)
    d1 = jnp.sum(jnp.abs(jnp.abs(x) - 1.0), axis=1)
    iod = jnp.abs(d1[:, None] + d1[None, :])
    mask = (jnp.arange(n)[:, None] > jnp.arange(n)[None, :]).astype(jnp.float32)
    notsim = jnp.maximum(BI_MARGIN - D, 0.0)
    loss = 0.5 * D * S + 0.5 * notsim * (1.0 - S) + TRADEOFF * iod
    return jnp.sum(loss * mask) / jnp.sum(mask)


if __name__ == "__main__":
    key = jax.random.PRNGKey(0)
    kx, kt = jax.random.split(key)

    # Primary small demo shape (batch = 8 hash codes of length 32).
    N, C = 8, 32
    x = jax.random.normal(kx, (N, C), dtype=jnp.float32) * 2.0
    target = jax.random.randint(kt, (N,), 0, 4, dtype=jnp.int32)

    loss = dsh_loss(x, target, use_pallas=True)   # force the kernel path at small N
    jax.block_until_ready(loss)
    ref = _dsh_loss_ref(x, target)
    assert jnp.allclose(loss, ref, rtol=1e-4, atol=1e-4), (loss, ref)

    # Exercise the tiled path: multiple lower-triangle blocks, per-row d1 hoisting,
    # diagonal/off-diagonal block weighting, and edge-block padding + masking.
    for n2, blk in ((384, 128), (200, 128)):
        kx2, kt2 = jax.random.split(jax.random.PRNGKey(n2))
        x2 = jax.random.normal(kx2, (n2, C), dtype=jnp.float32) * 2.0
        t2 = jax.random.randint(kt2, (n2,), 0, 4, dtype=jnp.int32)
        l2 = dsh_loss(x2, t2, block=blk, use_pallas=True)
        jax.block_until_ready(l2)
        r2 = _dsh_loss_ref(x2, t2)
        assert jnp.allclose(l2, r2, rtol=1e-4, atol=1e-4), (n2, l2, r2)

    print("KERNEL_OK")
</pallas_src>

<mosaic_0001>
module attributes {stable_mosaic.version = 11 : i64} {
  func.func @_dsh_tiled_kernel(%arg0: i32, %arg1: memref<1xi32, #tpu.memory_space<smem>>, %arg2: memref<1xi32, #tpu.memory_space<smem>>, %arg3: memref<128x32xf32, #tpu.memory_space<vmem>>, %arg4: memref<128x32xf32, #tpu.memory_space<vmem>>, %arg5: memref<128x1xi32, #tpu.memory_space<vmem>>, %arg6: memref<1x128xi32, #tpu.memory_space<vmem>>, %arg7: memref<1x1xf32, #tpu.memory_space<smem>>, %arg8: memref<1x128xf32, #tpu.memory_space<vmem>>, %arg9: memref<1xf32, #tpu.memory_space<smem>>) attributes {dimension_semantics = [#tpu.dimension_semantics<arbitrary>], iteration_bounds = array<i64: 1>, scalar_prefetch = 2 : i64, scratch_operands = 2 : i64, tpu.core_type = #tpu.core_type<tc>, window_params = [{transform_indices = @transform_0, window_bounds = array<i64: 128, 32>}, {transform_indices = @transform_1, window_bounds = array<i64: 128, 32>}, {transform_indices = @transform_2, window_bounds = array<i64: 128, 1>}, {transform_indices = @transform_3, window_bounds = array<i64: 1, 128>}, {transform_indices = @transform_4, window_bounds = array<i64: 1, 1>}]} {
    %0 = arith.index_cast %arg0 : i32 to index
    %1 = memref.load %arg1[%0] : memref<1xi32, #tpu.memory_space<smem>>
    %2 = arith.index_cast %arg0 : i32 to index
    %3 = memref.load %arg2[%2] : memref<1xi32, #tpu.memory_space<smem>>
    %c0_i32 = arith.constant 0 : i32
    %4 = arith.cmpi eq, %arg0, %c0_i32 : i32
    %5 = arith.extui %4 : i1 to i32
    %c0_i32_0 = arith.constant 0 : i32
    %6 = arith.cmpi ne, %5, %c0_i32_0 : i32
    scf.if %6 {
      %cst_29 = arith.constant 0.000000e+00 : f32
      %66 = vector.broadcast %cst_29 : f32 to vector<1x128xf32>
      %c0_30 = arith.constant 0 : index
      %c0_31 = arith.constant 0 : index
      %67 = vector.load %arg8[%c0_30, %c0_31] : memref<1x128xf32, #tpu.memory_space<vmem>>, vector<1x128xf32>
      tpu.vector_store %arg8[%c0_30, %c0_31], %66 {strides = array<i32>} : memref<1x128xf32, #tpu.memory_space<vmem>>, vector<1x128xf32>,
      %cst_32 = arith.constant 0.000000e+00 : f32
      %c0_33 = arith.constant 0 : index
      %68 = memref.load %arg9[%c0_33] : memref<1xf32, #tpu.memory_space<smem>>
      memref.store %cst_32, %arg9[%c0_33] : memref<1xf32, #tpu.memory_space<smem>>
    } else {
    }
    %c0 = arith.constant 0 : index
    %c0_1 = arith.constant 0 : index
    %7 = vector.load %arg3[%c0, %c0_1] : memref<128x32xf32, #tpu.memory_space<vmem>>, vector<128x32xf32>
    %c0_2 = arith.constant 0 : index
    %c0_3 = arith.constant 0 : index
    %8 = vector.load %arg4[%c0_2, %c0_3] : memref<128x32xf32, #tpu.memory_space<vmem>>, vector<128x32xf32>
    %cst = arith.constant 1.000000e+00 : f32
    %9 = vector.broadcast %cst : f32 to vector<1x32xf32>
    %cst_4 = arith.constant -2.000000e+00 : f32
    %10 = vector.broadcast %cst_4 : f32 to vector<128x32xf32>
    %11 = arith.mulf %7, %10 : vector<128x32xf32>
    %cst_5 = arith.constant dense<0.000000e+00> : vector<128x128xf32>
    %12 = tpu.matmul %11, %8, %cst_5 {dimension_numbers = #tpu.dot_dimension_numbers<[1], [1], [0], [0], [0, 0, 1, 0], [], []>} : vector<128x32xf32>, vector<128x32xf32>, vector<128x128xf32> -> vector<128x128xf32>
    %13 = arith.mulf %7, %7 : vector<128x32xf32>
    %cst_6 = arith.constant dense<0.000000e+00> : vector<128xf32>
    %14 = vector.multi_reduction <add>, %13, %cst_6 [1] : vector<128x32xf32> to vector<128xf32>
    %15 = vector.shape_cast %14 : vector<128xf32> to vector<128x1xf32>
    %16 = arith.mulf %8, %8 : vector<128x32xf32>
    %cst_7 = arith.constant dense<0.000000e+00> : vector<1x128xf32>
    %17 = tpu.matmul %9, %16, %cst_7 {dimension_numbers = #tpu.dot_dimension_numbers<[1], [1], [0], [0], [0, 0, 1, 0], [], []>} : vector<1x32xf32>, vector<128x32xf32>, vector<1x128xf32> -> vector<1x128xf32>
    %18 = vector.broadcast %17 : vector<1x128xf32> to vector<128x128xf32>
    %19 = arith.addf %12, %18 : vector<128x128xf32>
    %20 = vector.broadcast %15 : vector<128x1xf32> to vector<128x128xf32>
    %21 = arith.addf %20, %19 : vector<128x128xf32>
    %cst_8 = arith.constant 0.000000e+00 : f32
    %22 = vector.broadcast %cst_8 : f32 to vector<128x128xf32>
    %23 = arith.maximumf %21, %22 : vector<128x128xf32>
    %c0_9 = arith.constant 0 : index
    %c0_10 = arith.constant 0 : index
    %24 = vector.load %arg5[%c0_9, %c0_10] : memref<128x1xi32, #tpu.memory_space<vmem>>, vector<128x1xi32>
    %c0_11 = arith.constant 0 : index
    %c0_12 = arith.constant 0 : index
    %25 = vector.load %arg6[%c0_11, %c0_12] : memref<1x128xi32, #tpu.memory_space<vmem>>, vector<1x128xi32>
    %26 = vector.broadcast %24 : vector<128x1xi32> to vector<128x128xi32>
    %27 = vector.broadcast %25 : vector<1x128xi32> to vector<128x128xi32>
    %28 = arith.cmpi eq, %26, %27 : vector<128x128xi32>
    %cst_13 = arith.constant 2.400000e+01 : f32
    %29 = vector.broadcast %cst_13 : f32 to vector<128x128xf32>
    %30 = arith.subf %29, %23 : vector<128x128xf32>
    %cst_14 = arith.constant 0.000000e+00 : f32
    %31 = vector.broadcast %cst_14 : f32 to vector<128x128xf32>
    %32 = arith.maximumf %30, %31 : vector<128x128xf32>
    %33 = arith.select %28, %23, %32 : vector<128x128xi1>, vector<128x128xf32>
    %c128_i32 = arith.constant 128 : i32
    %34 = arith.muli %1, %c128_i32 : i32
    %35 = tpu.iota {dimensions = array<i32: 0>} : vector<128x1xi32>
    %36 = vector.broadcast %34 : i32 to vector<128x1xi32>
    %37 = arith.addi %36, %35 : vector<128x1xi32>
    %c128_i32_15 = arith.constant 128 : i32
    %38 = arith.muli %3, %c128_i32_15 : i32
    %39 = tpu.iota {dimensions = array<i32: 1>} : vector<1x128xi32>
    %40 = vector.broadcast %38 : i32 to vector<1x128xi32>
    %41 = arith.addi %40, %39 : vector<1x128xi32>
    %c8_i32 = arith.constant 8 : i32
    %42 = vector.broadcast %c8_i32 : i32 to vector<128x1xi32>
    %43 = arith.cmpi slt, %37, %42 : vector<128x1xi32>
    %c8_i32_16 = arith.constant 8 : i32
    %44 = vector.broadcast %c8_i32_16 : i32 to vector<1x128xi32>
    %45 = arith.cmpi slt, %41, %44 : vector<1x128xi32>
    %46 = vector.broadcast %43 : vector<128x1xi1> to vector<128x128xi1>
    %47 = vector.broadcast %45 : vector<1x128xi1> to vector<128x128xi1>
    %48 = arith.andi %46, %47 : vector<128x128xi1>
    %cst_17 = arith.constant 0.000000e+00 : f32
    %49 = vector.broadcast %cst_17 : f32 to vector<128x128xf32>
    %50 = arith.select %48, %33, %49 : vector<128x128xi1>, vector<128x128xf32>
    %51 = arith.cmpi eq, %1, %3 : i32
    %cst_18 = arith.constant 1.000000e+00 : f32
    %cst_19 = arith.constant 2.000000e+00 : f32
    %52 = arith.select %51, %cst_18, %cst_19 : f32
    %c0_20 = arith.constant 0 : index
    %c0_21 = arith.constant 0 : index
    %53 = vector.load %arg8[%c0_20, %c0_21] : memref<1x128xf32, #tpu.memory_space<vmem>>, vector<1x128xf32>
    %cst_22 = arith.constant dense<0.000000e+00> : vector<128xf32>
    %54 = vector.multi_reduction <add>, %50, %cst_22 [0] : vector<128x128xf32> to vector<128xf32>
    %55 = vector.shape_cast %54 : vector<128xf32> to vector<1x128xf32>
    %56 = vector.broadcast %52 : f32 to vector<1x128xf32>
    %57 = arith.mulf %56, %55 : vector<1x128xf32>
    %58 = arith.addf %53, %57 : vector<1x128xf32>
    %c0_23 = arith.constant 0 : index
    %c0_24 = arith.constant 0 : index
    %59 = vector.load %arg8[%c0_23, %c0_24] : memref<1x128xf32, #tpu.memory_space<vmem>>, vector<1x128xf32>
    tpu.vector_store %arg8[%c0_23, %c0_24], %58 {strides = array<i32>} : memref<1x128xf32, #tpu.memory_space<vmem>>, vector<1x128xf32>,
    %c0_i32_25 = arith.constant 0 : i32
    %60 = arith.cmpi eq, %3, %c0_i32_25 : i32
    %61 = arith.extui %60 : i1 to i32
    %c0_i32_26 = arith.constant 0 : i32
    %62 = arith.cmpi ne, %61, %c0_i32_26 : i32
    scf.if %62 {
      %c0_29 = arith.constant 0 : index
      %66 = memref.load %arg9[%c0_29] : memref<1xf32, #tpu.memory_space<smem>>
      %67 = math.absf %7 : vector<128x32xf32>
      %cst_30 = arith.constant 1.000000e+00 : f32
      %68 = vector.broadcast %cst_30 : f32 to vector<128x32xf32>
      %69 = arith.subf %67, %68 : vector<128x32xf32>
      %70 = math.absf %69 : vector<128x32xf32>
      %71 = vector.shape_cast %70 : vector<128x32xf32> to vector<1x128x32xf32>
      %cst_31 = arith.constant dense<0.000000e+00> : vector<1xf32>
      %72 = vector.multi_reduction <add>, %71, %cst_31 [1, 2] : vector<1x128x32xf32> to vector<1xf32>
      %73 = vector.shape_cast %72 : vector<1xf32> to vector<1x1x1xf32>
      %74 = vector.extract %73[0, 0, 0] : f32 from vector<1x1x1xf32>
      %75 = arith.addf %66, %74 : f32
      %c0_32 = arith.constant 0 : index
      %76 = memref.load %arg9[%c0_32] : memref<1xf32, #tpu.memory_space<smem>>
      memref.store %75, %arg9[%c0_32] : memref<1xf32, #tpu.memory_space<smem>>
    } else {
    }
    %c0_i32_27 = arith.constant 0 : i32
    %63 = arith.cmpi eq, %arg0, %c0_i32_27 : i32
    %64 = arith.extui %63 : i1 to i32
    %c0_i32_28 = arith.constant 0 : i32
    %65 = arith.cmpi ne, %64, %c0_i32_28 : i32
    scf.if %65 {
      %c0_29 = arith.constant 0 : index
      %c0_30 = arith.constant 0 : index
      %66 = vector.load %arg8[%c0_29, %c0_30] : memref<1x128xf32, #tpu.memory_space<vmem>>, vector<1x128xf32>
      %67 = vector.shape_cast %66 : vector<1x128xf32> to vector<1x1x128xf32>
      %cst_31 = arith.constant dense<0.000000e+00> : vector<1xf32>
      %68 = vector.multi_reduction <add>, %67, %cst_31 [1, 2] : vector<1x1x128xf32> to vector<1xf32>
      %69 = vector.shape_cast %68 : vector<1xf32> to vector<1x1x1xf32>
      %70 = vector.extract %69[0, 0, 0] : f32 from vector<1x1x1xf32>
      %cst_32 = arith.constant 0.00892857183 : f32
      %71 = arith.mulf %cst_32, %70 : f32
      %c0_33 = arith.constant 0 : index
      %72 = memref.load %arg9[%c0_33] : memref<1xf32, #tpu.memory_space<smem>>
      %cst_34 = arith.constant 2.500000e-03 : f32
      %73 = arith.mulf %cst_34, %72 : f32
      %74 = arith.addf %71, %73 : f32
      %c0_35 = arith.constant 0 : index
      %c0_36 = arith.constant 0 : index
      %75 = memref.load %arg7[%c0_35, %c0_36] : memref<1x1xf32, #tpu.memory_space<smem>>
      memref.store %74, %arg7[%c0_35, %c0_36] : memref<1x1xf32, #tpu.memory_space<smem>>
    } else {
    }
    return
  }
  func.func @transform_0(%arg0: i32, %arg1: memref<1xi32, #tpu.memory_space<smem>>, %arg2: memref<1xi32, #tpu.memory_space<smem>>) -> (i32, i32) {
    %0 = arith.index_cast %arg0 : i32 to index
    %1 = memref.load %arg1[%0] : memref<1xi32, #tpu.memory_space<smem>>
    %c0_i32 = arith.constant 0 : i32
    %c0_i32_0 = arith.constant 0 : i32
    return %1, %c0_i32 : i32, i32
  }
  func.func @transform_1(%arg0: i32, %arg1: memref<1xi32, #tpu.memory_space<smem>>, %arg2: memref<1xi32, #tpu.memory_space<smem>>) -> (i32, i32) {
    %0 = arith.index_cast %arg0 : i32 to index
    %1 = memref.load %arg2[%0] : memref<1xi32, #tpu.memory_space<smem>>
    %c0_i32 = arith.constant 0 : i32
    %c0_i32_0 = arith.constant 0 : i32
    return %1, %c0_i32 : i32, i32
  }
  func.func @transform_2(%arg0: i32, %arg1: memref<1xi32, #tpu.memory_space<smem>>, %arg2: memref<1xi32, #tpu.memory_space<smem>>) -> (i32, i32) {
    %0 = arith.index_cast %arg0 : i32 to index
    %1 = memref.load %arg1[%0] : memref<1xi32, #tpu.memory_space<smem>>
    %c0_i32 = arith.constant 0 : i32
    %c0_i32_0 = arith.constant 0 : i32
    return %1, %c0_i32 : i32, i32
  }
  func.func @transform_3(%arg0: i32, %arg1: memref<1xi32, #tpu.memory_space<smem>>, %arg2: memref<1xi32, #tpu.memory_space<smem>>) -> (i32, i32) {
    %0 = arith.index_cast %arg0 : i32 to index
    %1 = memref.load %arg2[%0] : memref<1xi32, #tpu.memory_space<smem>>
    %c0_i32 = arith.constant 0 : i32
    %c0_i32_0 = arith.constant 0 : i32
    return %c0_i32, %1 : i32, i32
  }
  func.func @transform_4(%arg0: i32, %arg1: memref<1xi32, #tpu.memory_space<smem>>, %arg2: memref<1xi32, #tpu.memory_space<smem>>) -> (i32, i32) {
    %c0_i32 = arith.constant 0 : i32
    %c0_i32_0 = arith.constant 0 : i32
    %c0_i32_1 = arith.constant 0 : i32
    return %c0_i32, %c0_i32_0 : i32, i32
  }
}

</mosaic_0001>

<bundles_post_ra>
// kernel: tpu_custom_call.1
= control target key start
LH: loop header
LB: loop body
LE: loop exit
PB: predicated region body
PF: predicated region fallthrough
CT: control target
= control target key end

     0   :  { %s1687_s0 = inlined_call_operand.<no memory space> [shape: s32[1], index: 0, kind: input, shape index: {}]   ;;  %s1688_s1 = inlined_call_operand.<no memory space> [shape: s32[1], index: 1, kind: input, shape index: {}]   ;;  %s1689_s2 = inlined_call_operand.vmem [shape: f32[128,32], index: 2, kind: input, shape index: {}]   ;;  %s1690_s3 = inlined_call_operand.vmem [shape: f32[128,32], index: 3, kind: input, shape index: {}]   ;;  %s1691_s4 = inlined_call_operand.vmem [shape: s32[128,1], index: 4, kind: input, shape index: {}]   ;;  %s1692_s5 = inlined_call_operand.vmem [shape: s32[1,128], index: 5, kind: input, shape index: {}]   ;;  %s1693_s6 = inlined_call_operand.hbm [shape: f32[1,1], index: 6, kind: output, shape index: {}]  }
   0x1   :  { %s941_s23 = sshll.u32 %s1688_s1, 4 }
   0x2   :  { %13 = vsyncpa [#allocation8], 0  ;;  %p83_p0 = scmp.lt.s32.totalorder %s941_s23, 15  ;;  %s1072_s24 = smov 0.0   ;;  %vm175_vm0 = vcmask 261120   ;;  %v1073_v56 = vmov 0  }
   0x3   :  { %110 = sst [smem:[#allocation3]] %s1072_s24  ;;  %s939_s27 = sshll.u32 %s1687_s0, 4  ;;  %1054 = vset.pattern.permute.xlu1 %v1073_v56  ;;  %1055 = vset.pattern.permute.xlu2 %v1073_v56 }
   0x4   :  { %s1717_s23 = smov (!%p83_p0, %s941_s23), 15  ;;  %p75_p1 = scmp.lt.s32.totalorder %s939_s27, 15  ;;  %1056 = vset.pattern.permute.xlu0 %v1073_v56 }
   0x5   :  { %s942_s28 = sshll.u32 %s1717_s23, 3  ;;  %p98_p2 = scmp.lt.s32.totalorder %s1688_s1, 0 }
   0x6   :  { %s1121_s7 = scalar_lea.vmem %s1690_s3, %s942_s28  ;;  %s1719_s27 = smov (!%p75_p1, %s939_s27), 15 }
   0x7   :  { %v142_v0 = vld [vmem:[%s1121_s7 + $0x78] sm:$0xff]  ;;  %v141_v1 = vld [vmem:[%s1121_s7 + $0x70] sm:$0xff]  ;;  %s940_s8 = sshll.u32 %s1719_s27, 3  ;;  %v140_v5 = vld [vmem:[%s1121_s7 + $0x68] sm:$0xff]  ;;  %s995_s22 = sshll.u32 %s1688_s1, 7 }
   0x8   :  { %962 = vmatpush.xpose.msk.msra.mxu1 %vm175_vm0, %v142_v0  ;;  %1013 = vmatpush.xpose.msk.msra.mxu2 %vm175_vm0, %v142_v0  ;;  %v239_v2 = vmul.f32 %v142_v0, %v142_v0  ;;  %v238_v3 = vmul.f32 %v141_v1, %v141_v1  ;;  %s1137_s10 = scalar_lea.vmem %s1689_s2, %s940_s8  ;;  %v237_v14 = vmul.f32 %v140_v5, %v140_v5  ;;  %v139_v16 = vld [vmem:[%s1121_s7 + $0x60] sm:$0xff]  ;;  %v138_v23 = vld [vmem:[%s1121_s7 + $0x58] sm:$0xff]  ;;  %v137_v30 = vld [vmem:[%s1121_s7 + $0x50] sm:$0xff]  ;;  %s1322_s20 = scalar_lea.vmem %s1691_s4, %s940_s8 }
   0x9   :  { %1014 = vmatpush.xpose.msk.msra.mxu3 %vm175_vm0, %v142_v0  ;;  %v1140_v4 = vld [vmem:[%s1137_s10 + $0x10] sm:$0xff]  ;;  %v1144_v6 = vld [vmem:[%s1137_s10 + $0x20] sm:$0xff]  ;;  %v1157_v10 = vld [vmem:[%s1137_s10 + $0x18] sm:$0xff]  ;;  %v236_v21 = vmul.f32 %v139_v16, %v139_v16  ;;  %v235_v28 = vmul.f32 %v138_v23, %v138_v23  ;;  %v234_v34 = vmul.f32 %v137_v30, %v137_v30  ;;  %s1249_s14 = scalar_select %p98_p2, %s1688_s1, 0 }
   0xa   :  { %945 = vmatpush.xpose.msk.msra.mxu0 %vm175_vm0, %v239_v2  ;;  %v161_v7 = vmul.f32 %v1140_v4, %v1140_v4  ;;  %v163_v8 = vmul.f32 %v1144_v6, %v1144_v6  ;;  %v1153_v9 = vld [vmem:[%s1137_s10] sm:$0xff]  ;;  %v1160_v11 = vld [vmem:[%s1137_s10 + $0x28] sm:$0xff]  ;;  %v162_v19 = vmul.f32 %v1157_v10, %v1157_v10  ;;  %v1189_v26 = vld [vmem:[%s1137_s10 + $0x38] sm:$0xff]  ;;  %s994_s25 = sshll.u32 %s1687_s0, 7  ;;  %p758_p3 = scmp.eq.s32.totalorder %s1687_s0, %s1688_s1 }
   0xb   :  { %v159_v12 = vmul.f32 %v1153_v9, %v1153_v9  ;;  %v1170_v18 = vld [vmem:[%s1137_s10 + $0x8] sm:$0xff]  ;;  %v164_v20 = vmul.f32 %v1160_v11, %v1160_v11  ;;  %v1192_v27 = vld [vmem:[%s1137_s10 + $0x40] sm:$0xff]  ;;  %v1198_v31 = vld [vmem:[%s1137_s10 + $0x30] sm:$0xff]  ;;  %v166_v32 = vmul.f32 %v1189_v26, %v1189_v26  ;;  %s100_s17 = scalar_lea.vmem %s1692_s5, %s1249_s14  ;;  %p996_p4 = scmp.ne.s32.totalorder %s1688_s1, 0 }
   0xc   :  { %963 = vmatpush.xpose.msk.msra.mxu1 %vm175_vm0, %v141_v1  ;;  %1015 = vmatpush.xpose.msk.msra.mxu2 %vm175_vm0, %v141_v1  ;;  %v182_v13 = vsel %vm175_vm0, %v161_v7, 0.0  ;;  %v188_v15 = vsel %vm175_vm0, %v163_v8, 0.0  ;;  %v160_v22 = vmul.f32 %v1170_v18, %v1170_v18  ;;  %v185_v24 = vsel %vm175_vm0, %v162_v19, 0.0  ;;  %v136_v36 = vld [vmem:[%s1121_s7 + $0x48] sm:$0xff]  ;;  %v1217_v39 = vld [vmem:[%s1137_s10 + $0x50] sm:$0xff]  ;;  %v1220_v40 = vld [vmem:[%s1137_s10 + $0x58] sm:$0xff] }
   0xd   :  { %1016 = vmatpush.xpose.msk.msra.mxu3 %vm175_vm0, %v141_v1  ;;  %183 = vadd.xlane.f32.xlu1 %v182_v13  ;;  %v176_v17 = vsel %vm175_vm0, %v159_v12, 0.0  ;;  %v191_v25 = vsel %vm175_vm0, %v164_v20, 0.0  ;;  %v167_v33 = vmul.f32 %v1192_v27, %v1192_v27  ;;  %v165_v35 = vmul.f32 %v1198_v31, %v1198_v31  ;;  %v135_v43 = vld [vmem:[%s1121_s7 + $0x40] sm:$0xff]  ;;  %v1226_v44 = vld [vmem:[%s1137_s10 + $0x48] sm:$0xff]  ;;  %v134_v49 = vld [vmem:[%s1121_s7 + $0x38] sm:$0xff]  ;;  %s790_s0 = sld [smem:[#allocation3]] (!%p996_p4) }
   0xe   :  { %946 = vmatpush.xpose.msk.msra.mxu0 %vm175_vm0, %v238_v3  ;;  %189 = vadd.xlane.f32.xlu2 %v188_v15  ;;  %v179_v29 = vsel %vm175_vm0, %v160_v22, 0.0  ;;  %v197_v37 = vsel %vm175_vm0, %v166_v32, 0.0  ;;  %v233_v41 = vmul.f32 %v136_v36, %v136_v36  ;;  %v169_v45 = vmul.f32 %v1217_v39, %v1217_v39  ;;  %v1253_v52 = vld [vmem:[%s1137_s10 + $0x68] sm:$0xff]  ;;  %v1256_v53 = vld [vmem:[%s1137_s10 + $0x70] sm:$0xff]  ;;  %v1266_v58 = vld [vmem:[%s1137_s10 + $0x60] sm:$0xff] }
   0xf   :  { %177 = vadd.xlane.f32.xlu0 %v176_v17  ;;  %v200_v38 = vsel %vm175_vm0, %v167_v33, 0.0  ;;  %v194_v42 = vsel %vm175_vm0, %v165_v35, 0.0  ;;  %v170_v46 = vmul.f32 %v1220_v40, %v1220_v40  ;;  %v232_v47 = vmul.f32 %v135_v43, %v135_v43  ;;  %v133_v57 = vld [vmem:[%s1121_s7 + $0x30] sm:$0xff]  ;;  %v132_v63 = vld [vmem:[%s1121_s7 + $0x28] sm:$0xff]  ;;  %v1288_v7 = vld [vmem:[%s1137_s10 + $0x78] sm:$0xff] }
  0x10   :  { %964 = vmatpush.xpose.msk.msra.mxu1 %vm175_vm0, %v140_v5  ;;  %1017 = vmatpush.xpose.msk.msra.mxu2 %vm175_vm0, %v140_v5  ;;  %v168_v48 = vmul.f32 %v1226_v44, %v1226_v44  ;;  %v206_v50 = vsel %vm175_vm0, %v169_v45, 0.0  ;;  %v231_v54 = vmul.f32 %v134_v49, %v134_v49  ;;  %v172_v59 = vmul.f32 %v1253_v52, %v1253_v52  ;;  %v130_v13 = vld [vmem:[%s1121_s7 + $0x18] sm:$0xff]  ;;  %v128_v19 = vld [vmem:[%s1121_s7 + $0x8] sm:$0xff]  ;;  %v507_v32 = vld [vmem:[%s1322_s20 + $0x10] sm:$0xff] }
  0x11   :  { %1018 = vmatpush.xpose.msk.msra.mxu3 %vm175_vm0, %v140_v5  ;;  %v209_v51 = vsel %vm175_vm0, %v170_v46, 0.0  ;;  %v173_v60 = vmul.f32 %v1256_v53, %v1256_v53  ;;  %v230_v61 = vmul.f32 %v133_v57, %v133_v57  ;;  %v171_v62 = vmul.f32 %v1266_v58, %v1266_v58  ;;  %v131_v5 = vld [vmem:[%s1121_s7 + $0x20] sm:$0xff]  ;;  %v511_v45 = vld [vmem:[%s1322_s20 + $0x30] sm:$0xff]  ;;  %v510_v46 = vld [vmem:[%s1322_s20 + $0x28] sm:$0xff] }
  0x12   :  { %947 = vmatpush.xpose.msk.msra.mxu0 %vm175_vm0, %v237_v14  ;;  %v203_v55 = vsel %vm175_vm0, %v168_v48, 0.0  ;;  %v215_v0 = vsel %vm175_vm0, %v172_v59, 0.0  ;;  %v229_v2 = vmul.f32 %v132_v63, %v132_v63  ;;  %v228_v8 = vmul.f32 %v131_v5, %v131_v5  ;;  %v515_v59 = vld [vmem:[%s1322_s20 + $0x50] sm:$0xff] }
  0x13   :  { %v218_v1 = vsel %vm175_vm0, %v173_v60, 0.0  ;;  %v212_v3 = vsel %vm175_vm0, %v171_v62, 0.0  ;;  %v174_v12 = vmul.f32 %v1288_v7, %v1288_v7  ;;  %v227_v14 = vmul.f32 %v130_v13, %v130_v13  ;;  %v518_v62 = vld [vmem:[%s1322_s20 + $0x68] sm:$0xff] }
  0x14   :  { %965 = vmatpush.xpose.msk.msra.mxu1 %vm175_vm0, %v139_v16  ;;  %1019 = vmatpush.xpose.msk.msra.mxu2 %vm175_vm0, %v139_v16  ;;  %v225_v20 = vmul.f32 %v128_v19, %v128_v19  ;;  %v147_v33 = vmul.f32 -2.0, %v1144_v6  ;;  %v152_v35 = vmul.f32 -2.0, %v1226_v44  ;;  %v149_v48 = vmul.f32 -2.0, %v1198_v31 }
  0x15   :  { %1020 = vmatpush.xpose.msk.msra.mxu3 %vm175_vm0, %v139_v16  ;;  %186 = vadd.xlane.f32.xlu1 %v185_v24  ;;  %v221_v15 = vsel %vm175_vm0, %v174_v12, 0.0  ;;  %v129_v16 = vld [vmem:[%s1121_s7 + $0x10] sm:$0xff]  ;;  %v146_v24 = vmul.f32 -2.0, %v1157_v10  ;;  %v155_v56 = vmul.f32 -2.0, %v1266_v58  ;;  %v156_v60 = vmul.f32 -2.0, %v1253_v52 }
  0x16   :  { %948 = vmatpush.xpose.msk.msra.mxu0 %vm175_vm0, %v236_v21  ;;  %192 = vadd.xlane.f32.xlu2 %v191_v25  ;;  %v226_v17 = vmul.f32 %v129_v16, %v129_v16  ;;  %v127_v21 = vld [vmem:[%s1121_s7] sm:$0xff]  ;;  %v151_v25 = vmul.f32 -2.0, %v1192_v27  ;;  %s759_s7 = scalar_select %p758_p3, 1.0, 2.0 }
  0x17   :  { %180 = vadd.xlane.f32.xlu0 %v179_v29  ;;  %v224_v22 = vmul.f32 %v127_v21, %v127_v21  ;;  %v506_v29 = vld [vmem:[%s1322_s20 + $0x8] sm:$0xff] }
  0x18   :  { %966 = vmatpush.xpose.msk.msra.mxu1 %vm175_vm0, %v138_v23  ;;  %1021 = vmatpush.xpose.msk.msra.mxu2 %vm175_vm0, %v138_v23 }
  0x19   :  { %1022 = vmatpush.xpose.msk.msra.mxu3 %vm175_vm0, %v138_v23  ;;  %v143_v23 = vmul.f32 -2.0, %v1153_v9 }
  0x1a   :  { %949 = vmatpush.xpose.msk.msra.mxu0 %vm175_vm0, %v235_v28  ;;  %v505_v28 = vld [vmem:[%s1322_s20] sm:$0xff] }
  0x1c   :  { %967 = vmatpush.xpose.msk.msra.mxu1 %vm175_vm0, %v137_v30  ;;  %1023 = vmatpush.xpose.msk.msra.mxu2 %vm175_vm0, %v137_v30 }
  0x1d   :  { %1024 = vmatpush.xpose.msk.msra.mxu3 %vm175_vm0, %v137_v30  ;;  %198 = vadd.xlane.f32.xlu1 %v197_v37  ;;  %v1074_v30 = vmov 1.0   ;;  %v508_v37 = vld [vmem:[%s1322_s20 + $0x18] sm:$0xff] }
  0x1e   :  { %950 = vmatpush.xpose.msk.msra.mxu0 %vm175_vm0, %v234_v34  ;;  %201 = vadd.xlane.f32.xlu2 %v200_v38  ;;  %v144_v34 = vmul.f32 -2.0, %v1170_v18  ;;  %v514_v38 = vld [vmem:[%s1322_s20 + $0x48] sm:$0xff] }
  0x1f   :  { %195 = vadd.xlane.f32.xlu0 %v194_v42  ;;  %v148_v42 = vmul.f32 -2.0, %v1160_v11 }
  0x20   :  { %968 = vmatpush.xpose.msk.msra.mxu1 %vm175_vm0, %v136_v36  ;;  %1025 = vmatpush.xpose.msk.msra.mxu2 %vm175_vm0, %v136_v36 }
  0x21   :  { %1026 = vmatpush.xpose.msk.msra.mxu3 %vm175_vm0, %v136_v36  ;;  %v509_v36 = vld [vmem:[%s1322_s20 + $0x20] sm:$0xff] }
  0x22   :  { %951 = vmatpush.xpose.msk.msra.mxu0 %vm175_vm0, %v233_v41  ;;  %v145_v41 = vmul.f32 -2.0, %v1140_v4 }
  0x24   :  { %969 = vmatpush.xpose.msk.msra.mxu1 %vm175_vm0, %v135_v43  ;;  %1027 = vmatpush.xpose.msk.msra.mxu2 %vm175_vm0, %v135_v43 }
  0x25   :  { %1028 = vmatpush.xpose.msk.msra.mxu3 %vm175_vm0, %v135_v43  ;;  %207 = vadd.xlane.f32.xlu1 %v206_v50  ;;  %v153_v43 = vmul.f32 -2.0, %v1217_v39  ;;  %v513_v50 = vld [vmem:[%s1322_s20 + $0x40] sm:$0xff] }
  0x26   :  { %952 = vmatpush.xpose.msk.msra.mxu0 %vm175_vm0, %v232_v47  ;;  %210 = vadd.xlane.f32.xlu2 %v209_v51  ;;  %v517_v47 = vld [vmem:[%s1322_s20 + $0x60] sm:$0xff]  ;;  %v512_v51 = vld [vmem:[%s1322_s20 + $0x38] sm:$0xff] }
  0x27   :  { %204 = vadd.xlane.f32.xlu0 %v203_v55  ;;  %v150_v55 = vmul.f32 -2.0, %v1189_v26 }
  0x28   :  { %970 = vmatpush.xpose.msk.msra.mxu1 %vm175_vm0, %v134_v49  ;;  %1029 = vmatpush.xpose.msk.msra.mxu2 %vm175_vm0, %v134_v49 }
  0x29   :  { %1030 = vmatpush.xpose.msk.msra.mxu3 %vm175_vm0, %v134_v49  ;;  %v154_v49 = vmul.f32 -2.0, %v1220_v40 }
  0x2a   :  { %953 = vmatpush.xpose.msk.msra.mxu0 %vm175_vm0, %v231_v54  ;;  %v520_v54 = vld [vmem:[%s1322_s20 + $0x78] sm:$0xff] }
  0x2c   :  { %971 = vmatpush.xpose.msk.msra.mxu1 %vm175_vm0, %v133_v57  ;;  %1031 = vmatpush.xpose.msk.msra.mxu2 %vm175_vm0, %v133_v57 }
  0x2d   :  { %1032 = vmatpush.xpose.msk.msra.mxu3 %vm175_vm0, %v133_v57  ;;  %216 = vadd.xlane.f32.xlu1 %v215_v0  ;;  %v516_v57 = vld [vmem:[%s1322_s20 + $0x58] sm:$0xff]  ;;  %v158_v0 = vmul.f32 -2.0, %v1288_v7 }
  0x2e   :  { %954 = vmatpush.xpose.msk.msra.mxu0 %vm175_vm0, %v230_v61  ;;  %219 = vadd.xlane.f32.xlu2 %v218_v1  ;;  %v519_v61 = vld [vmem:[%s1322_s20 + $0x70] sm:$0xff] }
  0x2f   :  { %213 = vadd.xlane.f32.xlu0 %v212_v3 }
  0x30   :  { %972 = vmatpush.xpose.msk.msra.mxu1 %vm175_vm0, %v132_v63  ;;  %1033 = vmatpush.xpose.msk.msra.mxu2 %vm175_vm0, %v132_v63 }
  0x31   :  { %1034 = vmatpush.xpose.msk.msra.mxu3 %vm175_vm0, %v132_v63  ;;  %v157_v63 = vmul.f32 -2.0, %v1256_v53 }
  0x32   :  { %955 = vmatpush.xpose.msk.msra.mxu0 %vm175_vm0, %v229_v2 }
  0x34   :  { %973 = vmatpush.xpose.msk.msra.mxu1 %vm175_vm0, %v131_v5  ;;  %1035 = vmatpush.xpose.msk.msra.mxu2 %vm175_vm0, %v131_v5 }
  0x35   :  { %1036 = vmatpush.xpose.msk.msra.mxu3 %vm175_vm0, %v131_v5 }
  0x36   :  { %956 = vmatpush.xpose.msk.msra.mxu0 %vm175_vm0, %v228_v8 }
  0x37   :  { %222 = vadd.xlane.f32.xlu0 %v221_v15 }
  0x38   :  { %974 = vmatpush.xpose.msk.msra.mxu1 %vm175_vm0, %v130_v13  ;;  %1037 = vmatpush.xpose.msk.msra.mxu2 %vm175_vm0, %v130_v13 }
  0x39   :  { %1038 = vmatpush.xpose.msk.msra.mxu3 %vm175_vm0, %v130_v13 }
  0x3a   :  { %957 = vmatpush.xpose.msk.msra.mxu0 %vm175_vm0, %v227_v14 }
  0x3c   :  { %975 = vmatpush.xpose.msk.msra.mxu1 %vm175_vm0, %v129_v16  ;;  %1039 = vmatpush.xpose.msk.msra.mxu2 %vm175_vm0, %v129_v16 }
  0x3d   :  { %1040 = vmatpush.xpose.msk.msra.mxu3 %vm175_vm0, %v129_v16 }
  0x3e   :  { %958 = vmatpush.xpose.msk.msra.mxu0 %vm175_vm0, %v226_v17 }
  0x40   :  { %976 = vmatpush.xpose.msk.msra.mxu1 %vm175_vm0, %v128_v19  ;;  %1041 = vmatpush.xpose.msk.msra.mxu2 %vm175_vm0, %v128_v19 }
  0x41   :  { %1042 = vmatpush.xpose.msk.msra.mxu3 %vm175_vm0, %v128_v19 }
  0x42   :  { %959 = vmatpush.xpose.msk.msra.mxu0 %vm175_vm0, %v225_v20 }
  0x44   :  { %977 = vmatpush.xpose.msk.msra.mxu1 %vm175_vm0, %v127_v21  ;;  %1043 = vmatpush.xpose.msk.msra.mxu2 %vm175_vm0, %v127_v21 }
  0x45   :  { %1044 = vmatpush.xpose.msk.msra.mxu3 %vm175_vm0, %v127_v21 }
  0x46   :  { %960 = vmatpush.xpose.msk.msra.mxu0 %vm175_vm0, %v224_v22  ;;  %523 = vperm.xlu1 %1054, %v505_v28  }
  0x47   :  { %981 = vmatmul.msk.f32.vlgmr.msra.gmra.mxu2 %vm175_vm0, %v146_v24  ;;  %978 = vmatmul.msk.f32.vlgmr.msra.gmra.mxu1 %vm175_vm0, %v143_v23 }
  0x48   :  { %986 = vmatmul.msk.f32.vlgmr.msra.gmra.mxu3 %vm175_vm0, %v151_v25  ;;  %526 = vperm.xlu2 %1055, %v506_v29  }
  0x49   :  { %961 = vmatmul.msk.f32.vlgmr.msra.gmra.mxu0 %vm175_vm0, %v1074_v30 }
  0x4b   :  { %529 = vperm.xlu0 %1056, %v507_v32  }
  0x4e   :  { %535 = vperm.xlu1 %1054, %v509_v36  }
  0x4f   :  { %982 = vmatmul.msk.f32.gmra.mxu2 %vm175_vm0, %v147_v33  ;;  %979 = vmatmul.msk.f32.gmra.mxu1 %vm175_vm0, %v144_v34  ;;  %v636_v34 = vlaneseq }
  0x50   :  { %987 = vmatmul.msk.f32.gmra.mxu3 %vm175_vm0, %v152_v35  ;;  %532 = vperm.xlu2 %1055, %v508_v37  }
  0x53   :  { %550 = vperm.xlu0 %1056, %v514_v38  }
  0x56   :  { %541 = vperm.xlu1 %1054, %v511_v45  }
  0x57   :  { %983 = vmatmul.msk.f32.gmra.mxu2 %vm175_vm0, %v148_v42  ;;  %980 = vmatmul.msk.f32.gmra.mxu1 %vm175_vm0, %v145_v41  ;;  %v1404_v42 = vshrl.u32 %v636_v34, 7 }
  0x58   :  { %988 = vmatmul.msk.f32.gmra.mxu3 %vm175_vm0, %v153_v43  ;;  %538 = vperm.xlu2 %1055, %v510_v46  }
  0x5b   :  { %559 = vperm.xlu0 %1056, %v517_v47  }
  0x5e   :  { %547 = vperm.xlu1 %1054, %v513_v50  }
  0x5f   :  { %984 = vmatmul.msk.f32.gmra.mxu2 %vm175_vm0, %v149_v48  ;;  %v672_v48 = vand.u32 127, %v636_v34 }
  0x60   :  { %989 = vmatmul.msk.f32.gmra.mxu3 %vm175_vm0, %v154_v49  ;;  %544 = vperm.xlu2 %1055, %v512_v51   ;;  %v638_v49 = vadd.s32 8, %v1404_v42  ;;  %v673_v51 = vstv %s995_s22 }
  0x63   :  { %568 = vperm.xlu0 %1056, %v520_v54  }
  0x66   :  { %556 = vperm.xlu1 %1054, %v516_v57   ;;  %v1420_v57 = vstv %s994_s25 }
  0x67   :  { %985 = vmatmul.msk.f32.gmra.mxu2 %vm175_vm0, %v150_v55 }
  0x68   :  { %990 = vmatmul.msk.f32.gmra.mxu3 %vm175_vm0, %v155_v56  ;;  %553 = vperm.xlu2 %1055, %v515_v59   ;;  %v639_v59 = vadd.s32 16, %v1404_v42 }
  0x6e   :  { %565 = vperm.xlu1 %1054, %v519_v61  }
  0x70   :  { %991 = vmatmul.msk.f32.gmra.mxu3 %vm175_vm0, %v156_v60  ;;  %562 = vperm.xlu2 %1055, %v518_v62  }
  0x78   :  { %992 = vmatmul.msk.f32.gmra.mxu3 %vm175_vm0, %v157_v63  ;;  %v1424_v63 = vadd.s32 %v673_v51, %v672_v48  ;;  %v645_v48 = vadd.s32 64, %v1404_v42 }
  0x7a   :  { %vm691_vm2 = vcmp.lt.s32.totalorder %v1424_v63, 8 }
  0x80   :  { %993 = vmatmul.msk.f32.gmra.mxu3 %vm175_vm0, %v158_v0  ;;  %v184_v2 = vpop.xlane.xlu1 %183  ;;  %v655_v0 = vadd.s32 %v1420_v57, %v638_v49 }
  0x81   :  { %v190_v1 = vpop.xlane.xlu2 %189 }
  0x82   :  { %v178_v3 = vpop.xlane.xlu0 %177  ;;  %vm676_vm3 = vcmp.lt.s32.totalorder %v655_v0, 8 }
  0x83   :  { %vm1458_vm8 = vmand %vm676_vm3, %vm691_vm2 }
  0x88   :  { %v187_v8 = vpop.xlane.xlu1 %186 }
  0x89   :  { %v1377_v5 = vpop.xlane.xlu2 %192 }
  0x8a   :  { %v181_v12 = vpop.xlane.xlu0 %180 }
  0x90   :  { %v1381_v14 = vpop.xlane.xlu1 %198 }
  0x91   :  { %v1379_v13 = vpop.xlane.xlu2 %201 }
  0x92   :  { %v1383_v15 = vpop.xlane.xlu0 %195 }
  0x98   :  { %v1387_v17 = vpop.xlane.xlu1 %207 }
  0x99   :  { %v1385_v16 = vpop.xlane.xlu2 %210 }
  0x9a   :  { %v1389_v19 = vpop.xlane.xlu0 %204 }
  0xa0   :  { %v1393_v23 = vpop.xlane.xlu1 %216 }
  0xa1   :  { %v1391_v22 = vpop.xlane.xlu2 %219 }
  0xa2   :  { %v1395_v24 = vpop.xlane.xlu0 %213 }
  0xa9   :  { %v527_v36 = vpop.permute.xlu2 %526 }
  0xaa   :  { %v1412_v45 = vpop.xlane.xlu0 %222 }
  0xb8   :  { %v524_v38 = vpop.permute.xlu1 %523 }
  0xc4   :  { %v425_v20 = vpop.f32.mrf.mxu1 }
  0xc6   :  { %v308_v21 = vpop.f32.mrf.mxu0 }
  0xc7   :  { %v1397_v25 = vperm.slane %v308_v21, 0 }
  0xc9   :  { %v426_v32 = vadd.f32 %v425_v20, %v1397_v25 }
  0xca   :  { %v434_v28 = vpop.f32.mrf.mxu2 }
  0xcb   :  { %v1399_v29 = vpop.f32.mrf.mxu3  ;;  %v473_v37 = vadd.f32 %v426_v32, %v178_v3  ;;  %v435_v41 = vadd.f32 %v434_v28, %v1397_v25  ;;  %v640_v28 = vadd.s32 24, %v1404_v42  ;;  %v533_v32 = vpop.permute.xlu2 %532 }
  0xcc   :  { %v428_v30 = vpop.f32.mrf.mxu1 }
  0xcd   :  { %v429_v33 = vadd.f32 %v428_v30, %v1397_v25  ;;  %v489_v54 = vmax.f32 %v473_v37, 0.0  ;;  %v1418_v56 = vadd.f32 %v435_v41, %v187_v8  ;;  %v1434_v8 = vld [vmem:[%s100_s17] ss:$0 sm:$0xff] }
  0xce   :  { %vm572_vm1 = vcmp.eq.s32.totalorder %v527_v36, %v1434_v8  ;;  %vm571_vm5 = vcmp.eq.s32.totalorder %v524_v38, %v1434_v8  ;;  %vm574_vm9 = vcmp.eq.s32.totalorder %v533_v32, %v1434_v8  ;;  %v450_v36 = vadd.f32 %v1399_v29, %v1397_v25 }
  0xcf   :  { %v474_v35 = vadd.f32 %v429_v33, %v181_v12  ;;  %v587_v3 = vsub.f32 24.0, %v489_v54  ;;  %v654_v12 = vadd.s32 %v1420_v57, %v1404_v42  ;;  %v492_v21 = vmax.f32 %v1418_v56, 0.0 }
  0xd0   :  { %v642_v29 = vadd.s32 40, %v1404_v42 }
  0xd1   :  { %v490_v46 = vmax.f32 %v474_v35, 0.0  ;;  %v603_v49 = vmax.f32 %v587_v3, 0.0  ;;  %vm675_vm4 = vcmp.lt.s32.totalorder %v654_v12, 8  ;;  %v590_v56 = vsub.f32 24.0, %v492_v21 }
  0xd2   :  { %v437_v43 = vpop.f32.mrf.mxu2  ;;  %vm1466_vm10 = vmand %vm675_vm4, %vm691_vm2 }
  0xd3   :  { %v1414_v47 = vpop.f32.mrf.mxu3  ;;  %v588_v60 = vsub.f32 24.0, %v490_v46  ;;  %v438_v61 = vadd.f32 %v437_v43, %v1397_v25  ;;  %v1443_v43 = vpop.permute.xlu1 %535 }
  0xd4   :  { %v431_v50 = vpop.f32.mrf.mxu1  ;;  %vm575_vm13 = vcmp.eq.s32.totalorder %v1443_v43, %v1434_v8 }
  0xd5   :  { %v432_v55 = vadd.f32 %v431_v50, %v1397_v25  ;;  %v604_v33 = vmax.f32 %v588_v60, 0.0  ;;  %v1439_v34 = vadd.f32 %v438_v61, %v190_v1  ;;  %v530_v50 = vpop.permute.xlu0 %529 }
  0xd6   :  { %vm573_vm6 = vcmp.eq.s32.totalorder %v530_v50, %v1434_v8  ;;  %v539_v50 = vpop.permute.xlu2 %538 }
  0xd7   :  { %v475_v62 = vadd.f32 %v432_v55, %v184_v2  ;;  %v656_v2 = vadd.s32 %v1420_v57, %v639_v59  ;;  %v641_v55 = vadd.s32 32, %v1404_v42  ;;  %v657_v59 = vadd.s32 %v1420_v57, %v640_v28 }
  0xd8   :  { %v620_v60 = vsel %vm572_vm1, %v490_v46, %v604_v33  ;;  %v619_v46 = vsel %vm571_vm5, %v489_v54, %v603_v49  ;;  %v1482_v28 = vadd.s32 %v1420_v57, %v645_v48  ;;  %v643_v49 = vadd.s32 48, %v1404_v42 }
  0xd9   :  { %v491_v20 = vmax.f32 %v475_v62, 0.0  ;;  %vm677_vm7 = vcmp.lt.s32.totalorder %v656_v2, 8  ;;  %v743_v12 = vsel %vm1458_vm8, %v620_v60, 0.0  ;;  %v658_v2 = vadd.s32 %v1420_v57, %v641_v55 }
  0xda   :  { %v440_v30 = vpop.f32.mrf.mxu2  ;;  %vm1474_vm11 = vmand %vm677_vm7, %vm691_vm2  ;;  %vm678_vm12 = vcmp.lt.s32.totalorder %v657_v59, 8  ;;  %v660_v0 = vadd.s32 %v1420_v57, %v643_v49  ;;  %vm576_vm1 = vcmp.eq.s32.totalorder %v539_v50, %v1434_v8 }
  0xdb   :  { %v589_v35 = vsub.f32 24.0, %v491_v20  ;;  %v441_v37 = vadd.f32 %v440_v30, %v1397_v25  ;;  %v455_v41 = vpop.f32.mrf.mxu3  ;;  %v542_v60 = vpop.permute.xlu1 %541  ;;  %vm679_vm14 = vcmp.lt.s32.totalorder %v658_v2, 8  ;;  %vm1507_vm15 = vmand %vm678_vm12, %vm691_vm2 }
  0xdc   :  { %v456_v61 = vadd.f32 %v455_v41, %v1397_v25  ;;  %v644_v41 = vadd.s32 56, %v1404_v42  ;;  %vm1530_vm4 = vmand %vm679_vm14, %vm691_vm2  ;;  %vm681_vm5 = vcmp.lt.s32.totalorder %v660_v0, 8  ;;  %vm577_vm7 = vcmp.eq.s32.totalorder %v542_v60, %v1434_v8 }
  0xdd   :  { %v605_v51 = vmax.f32 %v589_v35, 0.0  ;;  %v1448_v1 = vadd.f32 %v441_v37, %v1377_v5  ;;  %v493_v5 = vmax.f32 %v1439_v34, 0.0  ;;  %v742_v35 = vsel %vm1466_vm10, %v619_v46, 0.0  ;;  %vm1557_vm8 = vmand %vm681_vm5, %vm691_vm2 }
  0xde   :  { %v453_v37 = vadd.f32 %v1414_v47, %v1397_v25  ;;  %v659_v47 = vadd.s32 %v1420_v57, %v642_v29  ;;  %v1075_v29 = vmov 0.0   ;;  %v661_v43 = vadd.s32 %v1420_v57, %v644_v41  ;;  %v545_v50 = vpop.permute.xlu2 %544 }
  0xdf   :  { %v621_v62 = vsel %vm573_vm6, %v491_v20, %v605_v51  ;;  %v494_v3 = vmax.f32 %v1448_v1, 0.0  ;;  %v606_v20 = vmax.f32 %v590_v56, 0.0  ;;  %v591_v30 = vsub.f32 24.0, %v493_v5  ;;  %108 = vst [vmem:[#allocation2] sm:$0x1] %v1075_v29 }
  0xe0   :  { %v744_v48 = vsel %vm1474_vm11, %v621_v62, 0.0  ;;  %v1495_v51 = vadd.f32 %v450_v36, %v1379_v13  ;;  %v761_v1 = vadd.f32 %v743_v12, %v742_v35  ;;  %v1512_v62 = vadd.f32 %v453_v37, %v1389_v19 }
  0xe1   :  { %v592_v55 = vsub.f32 24.0, %v494_v3  ;;  %v622_v38 = vsel %vm574_vm9, %v492_v21, %v606_v20  ;;  %v646_v12 = vadd.s32 72, %v1404_v42  ;;  %vm680_vm3 = vcmp.lt.s32.totalorder %v659_v47, 8 }
  0xe2   :  { %v443_v54 = vpop.f32.mrf.mxu2  ;;  %v762_v36 = vadd.f32 %v761_v1, %v744_v48  ;;  %v497_v32 = vmax.f32 %v1495_v51, 0.0  ;;  %v1522_v19 = vadd.f32 %v456_v61, %v1387_v17  ;;  %v498_v17 = vmax.f32 %v1512_v62, 0.0  ;;  %vm1543_vm6 = vmand %vm680_vm3, %vm691_vm2 }
  0xe3   :  { %v444_v33 = vadd.f32 %v443_v54, %v1397_v25  ;;  %v458_v34 = vpop.f32.mrf.mxu3  ;;  %v608_v21 = vmax.f32 %v592_v55, 0.0  ;;  %v745_v54 = vsel %vm1507_vm15, %v622_v38, 0.0  ;;  %v663_v55 = vadd.s32 %v1420_v57, %v646_v12 }
  0xe4   :  { %v763_v35 = vadd.f32 %v762_v36, %v745_v54  ;;  %v459_v51 = vadd.f32 %v458_v34, %v1397_v25  ;;  %v499_v61 = vmax.f32 %v1522_v19, 0.0  ;;  %v596_v36 = vsub.f32 24.0, %v498_v17 }
  0xe5   :  { %v479_v56 = vadd.f32 %v444_v33, %v1383_v15  ;;  %v607_v15 = vmax.f32 %v591_v30, 0.0  ;;  %v624_v2 = vsel %vm576_vm1, %v494_v3, %v608_v21  ;;  %v647_v3 = vadd.s32 80, %v1404_v42 }
  0xe6   :  { %v747_v62 = vsel %vm1543_vm6, %v624_v2, 0.0  ;;  %v484_v41 = vadd.f32 %v459_v51, %v1385_v16  ;;  %vm682_vm9 = vcmp.lt.s32.totalorder %v661_v43, 8  ;;  %vm683_vm10 = vcmp.lt.s32.totalorder %v1482_v28, 8 }
  0xe7   :  { %v495_v46 = vmax.f32 %v479_v56, 0.0  ;;  %v623_v30 = vsel %vm575_vm13, %v493_v5, %v607_v15  ;;  %v595_v5 = vsub.f32 24.0, %v497_v32  ;;  %v548_v15 = vpop.permute.xlu1 %547  ;;  %vm684_vm11 = vcmp.lt.s32.totalorder %v663_v55, 8  ;;  %vm733_vm14 = vmand %vm682_vm9, %vm691_vm2 }
  0xe8   :  { %v746_v34 = vsel %vm1530_vm4, %v623_v30, 0.0  ;;  %vm578_vm12 = vcmp.eq.s32.totalorder %v545_v50, %v1434_v8  ;;  %vm579_vm13 = vcmp.eq.s32.totalorder %v548_v15, %v1434_v8  ;;  %v664_v12 = vadd.s32 %v1420_v57, %v647_v3  ;;  %vm1580_vm1 = vmand %vm683_vm10, %vm691_vm2  ;;  %v554_v50 = vpop.permute.xlu2 %553 }
  0xe9   :  { %v593_v59 = vsub.f32 24.0, %v495_v46  ;;  %v764_v38 = vadd.f32 %v763_v35, %v746_v34  ;;  %v611_v21 = vmax.f32 %v595_v5, 0.0  ;;  %v597_v54 = vsub.f32 24.0, %v499_v61  ;;  %vm1592_vm3 = vmand %vm684_vm11, %vm691_vm2 }
  0xea   :  { %v446_v20 = vpop.f32.mrf.mxu2  ;;  %v612_v30 = vmax.f32 %v596_v36, 0.0  ;;  %v500_v33 = vmax.f32 %v484_v41, 0.0  ;;  %v648_v51 = vadd.s32 88, %v1404_v42  ;;  %vm685_vm4 = vcmp.lt.s32.totalorder %v664_v12, 8 }
  0xeb   :  { %v609_v37 = vmax.f32 %v593_v59, 0.0  ;;  %v447_v48 = vadd.f32 %v446_v20, %v1397_v25  ;;  %v461_v49 = vpop.f32.mrf.mxu3  ;;  %v765_v29 = vadd.f32 %v764_v38, %v747_v62  ;;  %v613_v5 = vmax.f32 %v597_v54, 0.0  ;;  %vm1605_vm6 = vmand %vm685_vm4, %vm691_vm2 }
  0xec   :  { %v462_v60 = vadd.f32 %v461_v49, %v1397_v25  ;;  %v598_v34 = vsub.f32 24.0, %v500_v33  ;;  %v665_v38 = vadd.s32 %v1420_v57, %v648_v51  ;;  %v649_v13 = vadd.s32 96, %v1404_v42 }
  0xed   :  { %v480_v56 = vadd.f32 %v447_v48, %v1381_v14  ;;  %v625_v47 = vsel %vm577_vm7, %v495_v46, %v609_v37  ;;  %v551_v46 = vpop.permute.xlu0 %550  ;;  %v627_v48 = vsel %vm579_vm13, %v497_v32, %v611_v21  ;;  %vm581_vm5 = vcmp.eq.s32.totalorder %v554_v50, %v1434_v8 }
  0xee   :  { %v748_v59 = vsel %vm1557_vm8, %v625_v47, 0.0  ;;  %v485_v16 = vadd.f32 %v462_v60, %v1395_v24  ;;  %vm580_vm15 = vcmp.eq.s32.totalorder %v551_v46, %v1434_v8  ;;  %v629_v60 = vsel %vm581_vm5, %v499_v61, %v613_v5 }
  0xef   :  { %v496_v14 = vmax.f32 %v480_v56, 0.0  ;;  %v766_v49 = vadd.f32 %v765_v29, %v748_v59  ;;  %v750_v56 = vsel %vm1580_vm1, %v627_v48, 0.0  ;;  %v628_v32 = vsel %vm580_vm15, %v498_v17, %v612_v30 }
  0xf0   :  { %v501_v1 = vmax.f32 %v485_v16, 0.0  ;;  %v751_v55 = vsel %vm1592_vm3, %v628_v32, 0.0  ;;  %v650_v17 = vadd.s32 104, %v1404_v42  ;;  %v614_v62 = vmax.f32 %v598_v34, 0.0 }
  0xf1   :  { %v594_v0 = vsub.f32 24.0, %v496_v14  ;;  %vm686_vm7 = vcmp.lt.s32.totalorder %v665_v38, 8  ;;  %v666_v61 = vadd.s32 %v1420_v57, %v649_v13  ;;  %v752_v59 = vsel %vm1605_vm6, %v629_v60, 0.0 }
  0xf2   :  { %v599_v15 = vsub.f32 24.0, %v501_v1  ;;  %v667_v54 = vadd.s32 %v1420_v57, %v650_v17  ;;  %vm1619_vm9 = vmand %vm686_vm7, %vm691_vm2  ;;  %v652_v48 = vadd.s32 120, %v1404_v42 }
  0xf3   :  { %v610_v19 = vmax.f32 %v594_v0, 0.0  ;;  %v464_v20 = vpop.f32.mrf.mxu3  ;;  %v651_v0 = vadd.s32 112, %v1404_v42  ;;  %vm687_vm10 = vcmp.lt.s32.totalorder %v666_v61, 8 }
  0xf4   :  { %v465_v35 = vadd.f32 %v464_v20, %v1397_v25  ;;  %v615_v29 = vmax.f32 %v599_v15, 0.0  ;;  %vm738_vm13 = vmand %vm687_vm10, %vm691_vm2  ;;  %v669_v42 = vadd.s32 %v1420_v57, %v652_v48 }
  0xf5   :  { %v626_v24 = vsel %vm578_vm12, %v496_v14, %v610_v19  ;;  %v557_v14 = vpop.permute.xlu1 %556  ;;  %v560_v20 = vpop.permute.xlu0 %559  ;;  %vm688_vm12 = vcmp.lt.s32.totalorder %v667_v54, 8 }
  0xf6   :  { %v749_v43 = vsel %vm733_vm14, %v626_v24, 0.0  ;;  %v486_v3 = vadd.f32 %v465_v35, %v1393_v23  ;;  %vm582_vm8 = vcmp.eq.s32.totalorder %v557_v14, %v1434_v8  ;;  %vm583_vm11 = vcmp.eq.s32.totalorder %v560_v20, %v1434_v8  ;;  %vm739_vm3 = vmand %vm688_vm12, %vm691_vm2 }
  0xf7   :  { %v767_v2 = vadd.f32 %v766_v49, %v749_v43  ;;  %v630_v19 = vsel %vm582_vm8, %v500_v33, %v614_v62  ;;  %v631_v51 = vsel %vm583_vm11, %v501_v1, %v615_v29  ;;  %v563_v43 = vpop.permute.xlu2 %562  ;;  %vm690_vm5 = vcmp.lt.s32.totalorder %v669_v42, 8 }
  0xf8   :  { %v502_v21 = vmax.f32 %v486_v3, 0.0  ;;  %v753_v33 = vsel %vm1619_vm9, %v630_v19, 0.0  ;;  %vm584_vm15 = vcmp.eq.s32.totalorder %v563_v43, %v1434_v8  ;;  %v754_v1 = vsel %vm738_vm13, %v631_v51, 0.0  ;;  %vm741_vm6 = vmand %vm690_vm5, %vm691_vm2 }
  0xf9   :  { %v768_v47 = vadd.f32 %v767_v2, %v750_v56 }
  0xfa   :  { %v600_v35 = vsub.f32 24.0, %v502_v21 }
  0xfb   :  { %v467_v36 = vpop.f32.mrf.mxu3  ;;  %v769_v41 = vadd.f32 %v768_v47, %v751_v55 }
  0xfc   :  { %v468_v46 = vadd.f32 %v467_v36, %v1397_v25  ;;  %v616_v56 = vmax.f32 %v600_v35, 0.0 }
  0xfd   :  { %v770_v30 = vadd.f32 %v769_v41, %v752_v59  ;;  %v566_v5 = vpop.permute.xlu1 %565 }
  0xfe   :  { %v487_v12 = vadd.f32 %v468_v46, %v1391_v22  ;;  %v668_v22 = vadd.s32 %v1420_v57, %v651_v0  ;;  %vm585_vm1 = vcmp.eq.s32.totalorder %v566_v5, %v1434_v8  ;;  %v632_v50 = vsel %vm584_vm15, %v502_v21, %v616_v56  ;;  %v569_v57 = vpop.permute.xlu0 %568 }
  0xff   :  { %v771_v2 = vadd.f32 %v770_v30, %v753_v33  ;;  %vm586_vm7 = vcmp.eq.s32.totalorder %v569_v57, %v1434_v8  ;;  %v782_v46 = vstv %s759_s7  ;;  %v760_v8 = vld [vmem:[#allocation2] sm:$0x1] }
 0x100   :  { %v503_v37 = vmax.f32 %v487_v12, 0.0  ;;  %vm689_vm14 = vcmp.lt.s32.totalorder %v668_v22, 8 }
 0x101   :  { %v772_v3 = vadd.f32 %v771_v2, %v754_v1  ;;  %vm740_vm4 = vmand %vm689_vm14, %vm691_vm2 }
 0x102   :  { %v601_v49 = vsub.f32 24.0, %v503_v37 }
 0x103   :  { %v470_v24 = vpop.f32.mrf.mxu3 }
 0x104   :  { %v617_v28 = vmax.f32 %v601_v49, 0.0  ;;  %v471_v32 = vadd.f32 %v470_v24, %v1397_v25 }
 0x106   :  { %v488_v34 = vadd.f32 %v471_v32, %v1412_v45  ;;  %v633_v38 = vsel %vm585_vm1, %v503_v37, %v617_v28  ;;  %v755_v45 = vsel %vm739_vm3, %v632_v50, 0.0 }
 0x107   :  { %v756_v13 = vsel %vm740_vm4, %v633_v38, 0.0  ;;  %v773_v14 = vadd.f32 %v772_v3, %v755_v45 }
 0x108   :  { %v504_v25 = vmax.f32 %v488_v34, 0.0 }
 0x109   :  { %v774_v55 = vadd.f32 %v773_v14, %v756_v13 }
 0x10a   :  { %v602_v47 = vsub.f32 24.0, %v504_v25 }
 0x10c   :  { %v618_v60 = vmax.f32 %v602_v47, 0.0 }
 0x10e   :  { %v634_v15 = vsel %vm586_vm7, %v504_v25, %v618_v60 }
 0x10f   :  { %v757_v17 = vsel %vm741_vm6, %v634_v15, 0.0 }
 0x110   :  { %v775_v36 = vadd.f32 %v774_v55, %v757_v17 }
 0x112   :  { %v776_v23 = vrot.slane %v775_v36, 4 }
 0x114   :  { %v777_v62 = vadd.f32 %v776_v23, %v775_v36 }
 0x116   :  { %v778_v41 = vrot.slane %v777_v62, 2 }
 0x118   :  { %v779_v21 = vadd.f32 %v778_v41, %v777_v62 }
 0x11a   :  { %v780_v63 = vrot.slane %v779_v21, 1 }
 0x11c   :  { %v781_v61 = vadd.f32 %v780_v63, %v779_v21 }
 0x11e   :  { %v783_v0 = vmul.f32 %v782_v46, %v781_v61  ;;  %789 = sbr.rel (%p996_p4) target bundleno = 509 (0x1fd), region = 25 }
 0x120   :  { %v784_v12 = vadd.f32 %v783_v0, %v760_v8 }
 0x122   :  { %785 = vst [vmem:[#allocation2] sm:$0x1] %v784_v12 }
 0x123   :  { %v791_v59 = vand.u32 2147483647, %v1153_v9  ;;  %v792_v29 = vand.u32 2147483647, %v1170_v18  ;;  %v793_v54 = vand.u32 2147483647, %v1140_v4 }
 0x124   :  { %v794_v19 = vand.u32 2147483647, %v1157_v10  ;;  %v795_v16 = vand.u32 2147483647, %v1144_v6  ;;  %v796_v37 = vand.u32 2147483647, %v1160_v11 }
 0x125   :  { %v997_v20 = vadd.f32 -1.0, %v791_v59  ;;  %v998_v30 = vadd.f32 -1.0, %v792_v29  ;;  %v999_v35 = vadd.f32 -1.0, %v793_v54  ;;  %v797_v48 = vand.u32 2147483647, %v1198_v31 }
 0x126   :  { %v1000_v22 = vadd.f32 -1.0, %v794_v19  ;;  %v1001_v49 = vadd.f32 -1.0, %v795_v16  ;;  %v798_v18 = vand.u32 2147483647, %v1189_v26  ;;  %v1002_v24 = vadd.f32 -1.0, %v796_v37 }
 0x127   :  { %v823_v33 = vand.u32 2147483647, %v997_v20  ;;  %v824_v51 = vand.u32 2147483647, %v998_v30  ;;  %v825_v9 = vand.u32 2147483647, %v999_v35 }
 0x128   :  { %v826_v4 = vand.u32 2147483647, %v1000_v22  ;;  %v799_v10 = vand.u32 2147483647, %v1192_v27  ;;  %v1003_v43 = vadd.f32 -1.0, %v797_v48  ;;  %v1004_v28 = vadd.f32 -1.0, %v798_v18 }
 0x129   :  { %v827_v6 = vand.u32 2147483647, %v1001_v49  ;;  %v839_v5 = vsel %vm175_vm0, %v823_v33, 0.0  ;;  %v840_v2 = vsel %vm175_vm0, %v824_v51, 0.0  ;;  %v842_v56 = vsel %vm175_vm0, %v825_v9, 0.0 }
 0x12a   :  { %v841_v11 = vadd.f32 %v840_v2, %v839_v5  ;;  %v800_v31 = vand.u32 2147483647, %v1226_v44  ;;  %v828_v32 = vand.u32 2147483647, %v1002_v24  ;;  %v844_v42 = vsel %vm175_vm0, %v826_v4, 0.0 }
 0x12b   :  { %v801_v34 = vand.u32 2147483647, %v1217_v39  ;;  %v1005_v1 = vadd.f32 -1.0, %v799_v10  ;;  %v829_v27 = vand.u32 2147483647, %v1003_v43  ;;  %v846_v3 = vsel %vm175_vm0, %v827_v6, 0.0 }
 0x12c   :  { %v843_v26 = vadd.f32 %v842_v56, %v841_v11  ;;  %v802_v38 = vand.u32 2147483647, %v1220_v40  ;;  %v1006_v25 = vadd.f32 -1.0, %v800_v31  ;;  %v830_v57 = vand.u32 2147483647, %v1004_v28 }
 0x12d   :  { %v848_v47 = vsel %vm175_vm0, %v828_v32, 0.0  ;;  %v803_v44 = vand.u32 2147483647, %v1266_v58  ;;  %v1007_v13 = vadd.f32 -1.0, %v801_v34  ;;  %v831_v14 = vand.u32 2147483647, %v1005_v1 }
 0x12e   :  { %v845_v50 = vadd.f32 %v844_v42, %v843_v26  ;;  %v850_v60 = vsel %vm175_vm0, %v829_v27, 0.0  ;;  %v804_v39 = vand.u32 2147483647, %v1253_v52  ;;  %v1008_v15 = vadd.f32 -1.0, %v802_v38 }
 0x12f   :  { %v832_v17 = vand.u32 2147483647, %v1006_v25  ;;  %v852_v36 = vsel %vm175_vm0, %v830_v57, 0.0  ;;  %v805_v40 = vand.u32 2147483647, %v1256_v53  ;;  %v1009_v62 = vadd.f32 -1.0, %v803_v44 }
 0x130   :  { %v847_v45 = vadd.f32 %v846_v3, %v845_v50  ;;  %v833_v41 = vand.u32 2147483647, %v1007_v13  ;;  %v854_v21 = vsel %vm175_vm0, %v831_v14, 0.0  ;;  %v806_v58 = vand.u32 2147483647, %v1288_v7 }
 0x131   :  { %v1010_v46 = vadd.f32 -1.0, %v804_v39  ;;  %v834_v61 = vand.u32 2147483647, %v1008_v15  ;;  %v856_v8 = vsel %vm175_vm0, %v832_v17, 0.0  ;;  %v1011_v52 = vadd.f32 -1.0, %v805_v40 }
 0x132   :  { %v849_v55 = vadd.f32 %v848_v47, %v847_v45  ;;  %v835_v12 = vand.u32 2147483647, %v1009_v62  ;;  %v858_v59 = vsel %vm175_vm0, %v833_v41, 0.0  ;;  %v1012_v54 = vadd.f32 -1.0, %v806_v58 }
 0x133   :  { %v836_v19 = vand.u32 2147483647, %v1010_v46  ;;  %v860_v53 = vsel %vm175_vm0, %v834_v61, 0.0  ;;  %v837_v20 = vand.u32 2147483647, %v1011_v52 }
 0x134   :  { %v851_v23 = vadd.f32 %v850_v60, %v849_v55  ;;  %v862_v30 = vsel %vm175_vm0, %v835_v12, 0.0  ;;  %v838_v7 = vand.u32 2147483647, %v1012_v54 }
 0x135   :  { %v864_v37 = vsel %vm175_vm0, %v836_v19, 0.0  ;;  %v866_v48 = vsel %vm175_vm0, %v837_v20, 0.0 }
 0x136   :  { %v853_v63 = vadd.f32 %v852_v36, %v851_v23  ;;  %v868_v33 = vsel %vm175_vm0, %v838_v7, 0.0 }
 0x138   :  { %v855_v0 = vadd.f32 %v854_v21, %v853_v63 }
 0x13a   :  { %v857_v29 = vadd.f32 %v856_v8, %v855_v0 }
 0x13c   :  { %v859_v16 = vadd.f32 %v858_v59, %v857_v29 }
 0x13e   :  { %v861_v35 = vadd.f32 %v860_v53, %v859_v16 }
 0x140   :  { %v863_v22 = vadd.f32 %v862_v30, %v861_v35 }
 0x142   :  { %v865_v49 = vadd.f32 %v864_v37, %v863_v22 }
 0x144   :  { %v867_v51 = vadd.f32 %v866_v48, %v865_v49 }
 0x146   :  { %v869_v9 = vadd.f32 %v868_v33, %v867_v51 }
 0x148   :  { %870 = vadd.xlane.f32.xlu0 %v869_v9 }
 0x1bb   :  { %v871_v18 = vpop.xlane.xlu0 %870 }
 0x1bc   :  { %v872_v24 = vrot.slane %v871_v18, 4 }
 0x1be   :  { %v873_v4 = vadd.f32 %v872_v24, %v871_v18 }
 0x1c0   :  { %v874_v10 = vrot.slane %v873_v4, 2 }
 0x1c2   :  { %v875_v43 = vadd.f32 %v874_v10, %v873_v4 }
 0x1c4   :  { %v876_v6 = vrot.slane %v875_v43, 1 }
 0x1c6   :  { %v877_v5 = vadd.f32 %v876_v6, %v875_v43 }
 0x1c8   :  { %1045 = vpush %v877_v5 }
 0x1f9   :  { %s1046_s1 = spop %1045 }
 0x1fa   :  { %s879_s9 = sadd.f32 %s1046_s1, %s790_s0 }
 0x1fc   :  { %881 = sst [smem:[#allocation3]] %s879_s9 }
 0x1fd PF:  { %vm886_vm2 = vcmask 1040384   ;;  %s898_s10 = sld [smem:[#allocation3]]  ;;  %s908_s13 = sshll.u32 %s1693_s6, 4  ;;  %s909_s13 = int_to_ptr.hbm [resolvable:$true] %s908_s13 }
 0x1fe   :  { %s1076_s17 = smov [#allocation7]  }
 0x203   :  { %v885_v2 = vld [vmem:[#allocation2] sm:$0x1]  ;;  %s899_s2 = smul.f32 0.0025, %s898_s10 }
 0x204   :  { %v887_v11 = vsel %vm886_vm2, %v885_v2, 0.0 }
 0x205   :  { %888 = vadd.xlane.f32.xlu0 %v887_v11 }
 0x278   :  { %v889_v56 = vpop.xlane.xlu0 %888 }
 0x279   :  { %v890_v31 = vrot.slane %v889_v56, 4 }
 0x27b   :  { %v891_v28 = vadd.f32 %v890_v31, %v889_v56 }
 0x27d   :  { %v892_v32 = vrot.slane %v891_v28, 2 }
 0x27f   :  { %v893_v42 = vadd.f32 %v892_v32, %v891_v28 }
 0x281   :  { %v894_v26 = vrot.slane %v893_v42, 1 }
 0x283   :  { %v895_v34 = vadd.f32 %v894_v26, %v893_v42 }
 0x285   :  { %1047 = vpush %v895_v34 }
 0x2b6   :  { %s1048_s14 = spop %1047 }
 0x2b7   :  { %s897_s15 = smul.f32 0.008928572, %s1048_s14 }
 0x2b9   :  { %s900_s16 = sadd.f32 %s899_s2, %s897_s15 }
 0x2bb   :  { %902 = sst [smem:[#allocation7]] %s900_s16 }
 0x2bc   :  { %911 = dma.smem_to_hbm %s1076_s17, 16, %s909_s13, [#allocation8]  }
 0x2bd   :  { %1070 = dma.done.wait [#allocation8], 16  }
 0x2be   :  { %1071 = vsyncadd [#allocation8], 4294967280 }
 0x2bf   :  { %916 = sfence }
 0x2c0   :  { %917 = vsyncpa [#allocation8], 1 }

</bundles_post_ra>
